<compile_context>
chip_gen: v7x
topology: tpu7x:2x2x1
jax: 0.10.0
libtpu: 0.0.40
codegen_flags: <defaults>
</compile_context>

<pallas_src>
import jax
import jax.numpy as jnp
from jax.experimental import pallas as pl
from jax.experimental.pallas import tpu as pltpu


def bow_kernel(tok_ref, emb_ref, w_ref, b_ref, o_ref):
    # tok_ref: (Bb, L)  int32   token ids for Bb batch rows
    # emb_ref: (Vp, Dp) f32     frozen pretrained embedding table (zero-padded)
    # w_ref:   (Dp, Hp) f32     projection weight, stored transposed (x @ w)
    # b_ref:   (1, Hp)  f32     projection bias
    # o_ref:   (Bb, Hp) f32     output block
    tok = tok_ref[...]                                   # (Bb, L)
    Bb, L = tok.shape
    Vp = emb_ref.shape[0]

    # Vocab iota hoisted out of the token loop (JAX does not CSE broadcasts).
    vocab_ids = jax.lax.broadcasted_iota(jnp.int32, (Bb, Vp), 1)

    # counts[b, v] = #occurrences of token v in row b, accumulated one token
    # position at a time so the live set stays 2-D (Bb, Vp) and the reduce over
    # L becomes L plain VPU adds (no (Bb, L, V) intermediate, no XLU middle-axis
    # reduction).  L is small and static, so the Python loop fully unrolls with
    # static lane slices.
    counts = jnp.zeros((Bb, Vp), jnp.float32)
    for l in range(L):
        counts = counts + (tok[:, l:l + 1] == vocab_ids).astype(jnp.float32)

    # sum_l emb[tok[b, l]]  ==  counts @ emb_table   (MXU, (Bb,Vp)@(Vp,Dp)).
    # Precision note: Mosaic Pallas lowers only DEFAULT/HIGHEST; HIGHEST kept
    # to hold exact f32 parity with the reference (see header).
    bag = jnp.dot(counts, emb_ref[...],
                  preferred_element_type=jnp.float32,
                  precision=jax.lax.Precision.HIGHEST)

    # Fused projection: (Bb, Dp) @ (Dp, Hp) + bias -> (Bb, Hp).
    out = jnp.dot(bag, w_ref[...],
                  preferred_element_type=jnp.float32,
                  precision=jax.lax.Precision.HIGHEST) + b_ref[...]
    o_ref[...] = out.astype(o_ref.dtype)


def bow_forward(tokens, emb, w, b, *, block_b=128):
    """tokens: (B, L) int32; emb: (V, D) f32; w: (D, H) f32; b: (1, H) f32 -> (B, H) f32."""
    B, L = tokens.shape
    V, D = emb.shape
    H = w.shape[1]

    pad_to = lambda n, m: pl.cdiv(n, m) * m

    # Layout padding (mathematically exact): zero-padded emb columns / w rows /
    # never-matched vocab rows leave the result unchanged while making the MXU
    # operands and the output lane/sublane dense.
    Vp = pad_to(V, 8)
    Dp = pad_to(D, 128)
    Hp = pad_to(H, 128)
    if (Vp, Dp) != (V, D):
        emb = jnp.pad(emb, ((0, Vp - V), (0, Dp - D)))
    if (Dp, Hp) != (D, H):
        w = jnp.pad(w, ((0, Dp - D), (0, Hp - H)))
    if Hp != H:
        b = jnp.pad(b, ((0, 0), (0, Hp - H)))

    # Many batch rows per grid step (each sequential grid step costs ~0.35 us);
    # Bb kept a multiple of 8 for sublane tiling.
    Bb = min(pad_to(B, 8), block_b)
    Bp = pad_to(B, Bb)
    if Bp != B:
        tokens = jnp.pad(tokens, ((0, Bp - B), (0, 0)))  # padded rows sliced off below

    itemsize = 4
    resident = (Vp * Dp + Dp * Hp + Hp) * itemsize        # table + projection (constant maps)
    streamed = (Bb * L + Bb * Hp) * itemsize              # per-step token + output blocks
    # Explicit scoped-VMEM budget: x2 for the runtime's double buffering + slack.
    vmem_limit = int(min(max(2 * (resident + streamed) + (4 << 20), 16 << 20), 64 << 20))

    out = pl.pallas_call(
        bow_kernel,
        out_shape=jax.ShapeDtypeStruct((Bp, Hp), jnp.float32),
        grid_spec=pltpu.PrefetchScalarGridSpec(
            num_scalar_prefetch=0,
            grid=(Bp // Bb,),
            in_specs=[
                pl.BlockSpec((Bb, L), lambda i: (i, 0)),    # tokens: tiled over batch
                pl.BlockSpec((Vp, Dp), lambda i: (0, 0)),   # embedding table: resident
                pl.BlockSpec((Dp, Hp), lambda i: (0, 0)),   # proj weight: resident
                pl.BlockSpec((1, Hp), lambda i: (0, 0)),    # proj bias: resident
            ],
            out_specs=pl.BlockSpec((Bb, Hp), lambda i: (i, 0)),  # lane-dense 2-D output
        ),
        compiler_params=pltpu.CompilerParams(
            dimension_semantics=("parallel",),
            vmem_limit_bytes=vmem_limit,
        ),
        cost_estimate=pl.CostEstimate(
            flops=2 * Bp * Vp * Dp + 2 * Bp * Dp * Hp,
            transcendentals=0,
            bytes_accessed=(Bp * L + Vp * Dp + Dp * Hp + Hp + Bp * Hp) * itemsize,
        ),
    )(tokens, emb, w, b)
    return out[:B, :H]


def bow_reference(tokens, emb, w, b):
    """Pure-JAX reference mirroring the PyTorch forward exactly."""
    e = jnp.take(emb, tokens, axis=0)          # (B, L, D) embedding lookup
    bag = jnp.sum(e, axis=1)                   # (B, D)    .sum(1)
    return jnp.dot(bag, w, precision=jax.lax.Precision.HIGHEST) + b   # Linear(D, H)


if __name__ == "__main__":
    B, L = 8, 8            # batch_size, max_length
    V, D, H = 64, 32, 128  # vocab size, pretrained vector dim, hidden_dims

    key = jax.random.PRNGKey(0)
    kt, ke, kw, kb = jax.random.split(key, 4)

    tokens = jax.random.randint(kt, (B, L), 0, V, dtype=jnp.int32)
    emb = jax.random.normal(ke, (V, D), dtype=jnp.float32)
    emb = emb.at[0].set(0.0)  # padding_idx = 0 row (forward is still a plain lookup)

    # nn.Linear(D, H): PyTorch weight is (H, D); store transposed as (D, H).
    limit = jnp.sqrt(6.0 / (D + H))  # xavier_uniform
    w = (jax.random.uniform(kw, (D, H), dtype=jnp.float32) * 2.0 - 1.0) * limit
    b = (jax.random.uniform(kb, (1, H), dtype=jnp.float32) - 0.5) * 0.1

    out = bow_forward(tokens, emb, w, b)
    jax.block_until_ready(out)

    ref = bow_reference(tokens, emb, w, b)
    assert out.shape == (B, H)
    assert jnp.allclose(out, ref, atol=1e-4, rtol=1e-4), "mismatch vs reference"

    print("KERNEL_OK")
</pallas_src>

<mosaic_0001>
module attributes {stable_mosaic.version = 11 : i64} {
  func.func @bow_kernel(%arg0: i32, %arg1: memref<8x8xi32, #tpu.memory_space<vmem>>, %arg2: memref<64x128xf32, #tpu.memory_space<vmem>>, %arg3: memref<128x128xf32, #tpu.memory_space<vmem>>, %arg4: memref<1x128xf32, #tpu.memory_space<vmem>>, %arg5: memref<8x128xf32, #tpu.memory_space<vmem>>) attributes {dimension_semantics = [#tpu.dimension_semantics<parallel>], iteration_bounds = array<i64: 1>, scalar_prefetch = 0 : i64, scratch_operands = 0 : i64, tpu.core_type = #tpu.core_type<tc>, window_params = [{transform_indices = @transform_0, window_bounds = array<i64: 8, 8>}, {pipeline_mode = #tpu.pipeline_mode<synchronous>, transform_indices = @transform_1, window_bounds = array<i64: 64, 128>}, {pipeline_mode = #tpu.pipeline_mode<synchronous>, transform_indices = @transform_2, window_bounds = array<i64: 128, 128>}, {pipeline_mode = #tpu.pipeline_mode<synchronous>, transform_indices = @transform_3, window_bounds = array<i64: 1, 128>}, {transform_indices = @transform_4, window_bounds = array<i64: 8, 128>}]} {
    %c0 = arith.constant 0 : index
    %c0_0 = arith.constant 0 : index
    %0 = vector.load %arg1[%c0, %c0_0] : memref<8x8xi32, #tpu.memory_space<vmem>>, vector<8x8xi32>
    %1 = tpu.iota {dimensions = array<i32: 1>} : vector<8x64xi32>
    %cst = arith.constant 0.000000e+00 : f32
    %2 = vector.broadcast %cst : f32 to vector<8x64xf32>
    %3 = vector.extract_strided_slice %0 {offsets = [0, 0], sizes = [8, 1], strides = [1, 1]} : vector<8x8xi32> to vector<8x1xi32>
    %4 = vector.broadcast %3 : vector<8x1xi32> to vector<8x64xi32>
    %5 = arith.cmpi eq, %4, %1 : vector<8x64xi32>
    %6 = arith.extui %5 : vector<8x64xi1> to vector<8x64xi32>
    %7 = arith.sitofp %6 : vector<8x64xi32> to vector<8x64xf32>
    %8 = arith.addf %2, %7 : vector<8x64xf32>
    %9 = vector.extract_strided_slice %0 {offsets = [0, 1], sizes = [8, 1], strides = [1, 1]} : vector<8x8xi32> to vector<8x1xi32>
    %10 = vector.broadcast %9 : vector<8x1xi32> to vector<8x64xi32>
    %11 = arith.cmpi eq, %10, %1 : vector<8x64xi32>
    %12 = arith.extui %11 : vector<8x64xi1> to vector<8x64xi32>
    %13 = arith.sitofp %12 : vector<8x64xi32> to vector<8x64xf32>
    %14 = arith.addf %8, %13 : vector<8x64xf32>
    %15 = vector.extract_strided_slice %0 {offsets = [0, 2], sizes = [8, 1], strides = [1, 1]} : vector<8x8xi32> to vector<8x1xi32>
    %16 = vector.broadcast %15 : vector<8x1xi32> to vector<8x64xi32>
    %17 = arith.cmpi eq, %16, %1 : vector<8x64xi32>
    %18 = arith.extui %17 : vector<8x64xi1> to vector<8x64xi32>
    %19 = arith.sitofp %18 : vector<8x64xi32> to vector<8x64xf32>
    %20 = arith.addf %14, %19 : vector<8x64xf32>
    %21 = vector.extract_strided_slice %0 {offsets = [0, 3], sizes = [8, 1], strides = [1, 1]} : vector<8x8xi32> to vector<8x1xi32>
    %22 = vector.broadcast %21 : vector<8x1xi32> to vector<8x64xi32>
    %23 = arith.cmpi eq, %22, %1 : vector<8x64xi32>
    %24 = arith.extui %23 : vector<8x64xi1> to vector<8x64xi32>
    %25 = arith.sitofp %24 : vector<8x64xi32> to vector<8x64xf32>
    %26 = arith.addf %20, %25 : vector<8x64xf32>
    %27 = vector.extract_strided_slice %0 {offsets = [0, 4], sizes = [8, 1], strides = [1, 1]} : vector<8x8xi32> to vector<8x1xi32>
    %28 = vector.broadcast %27 : vector<8x1xi32> to vector<8x64xi32>
    %29 = arith.cmpi eq, %28, %1 : vector<8x64xi32>
    %30 = arith.extui %29 : vector<8x64xi1> to vector<8x64xi32>
    %31 = arith.sitofp %30 : vector<8x64xi32> to vector<8x64xf32>
    %32 = arith.addf %26, %31 : vector<8x64xf32>
    %33 = vector.extract_strided_slice %0 {offsets = [0, 5], sizes = [8, 1], strides = [1, 1]} : vector<8x8xi32> to vector<8x1xi32>
    %34 = vector.broadcast %33 : vector<8x1xi32> to vector<8x64xi32>
    %35 = arith.cmpi eq, %34, %1 : vector<8x64xi32>
    %36 = arith.extui %35 : vector<8x64xi1> to vector<8x64xi32>
    %37 = arith.sitofp %36 : vector<8x64xi32> to vector<8x64xf32>
    %38 = arith.addf %32, %37 : vector<8x64xf32>
    %39 = vector.extract_strided_slice %0 {offsets = [0, 6], sizes = [8, 1], strides = [1, 1]} : vector<8x8xi32> to vector<8x1xi32>
    %40 = vector.broadcast %39 : vector<8x1xi32> to vector<8x64xi32>
    %41 = arith.cmpi eq, %40, %1 : vector<8x64xi32>
    %42 = arith.extui %41 : vector<8x64xi1> to vector<8x64xi32>
    %43 = arith.sitofp %42 : vector<8x64xi32> to vector<8x64xf32>
    %44 = arith.addf %38, %43 : vector<8x64xf32>
    %45 = vector.extract_strided_slice %0 {offsets = [0, 7], sizes = [8, 1], strides = [1, 1]} : vector<8x8xi32> to vector<8x1xi32>
    %46 = vector.broadcast %45 : vector<8x1xi32> to vector<8x64xi32>
    %47 = arith.cmpi eq, %46, %1 : vector<8x64xi32>
    %48 = arith.extui %47 : vector<8x64xi1> to vector<8x64xi32>
    %49 = arith.sitofp %48 : vector<8x64xi32> to vector<8x64xf32>
    %50 = arith.addf %44, %49 : vector<8x64xf32>
    %c0_1 = arith.constant 0 : index
    %c0_2 = arith.constant 0 : index
    %51 = vector.load %arg2[%c0_1, %c0_2] : memref<64x128xf32, #tpu.memory_space<vmem>>, vector<64x128xf32>
    %cst_3 = arith.constant dense<0.000000e+00> : vector<8x128xf32>
    %52 = tpu.matmul %50, %51, %cst_3 {dimension_numbers = #tpu.dot_dimension_numbers<[1], [0], [0], [1], [0, 0, 1, 1], [], []>, precision = #tpu.contract_precision<fp32>} : vector<8x64xf32>, vector<64x128xf32>, vector<8x128xf32> -> vector<8x128xf32>
    %c0_4 = arith.constant 0 : index
    %c0_5 = arith.constant 0 : index
    %53 = vector.load %arg3[%c0_4, %c0_5] : memref<128x128xf32, #tpu.memory_space<vmem>>, vector<128x128xf32>
    %cst_6 = arith.constant dense<0.000000e+00> : vector<8x128xf32>
    %54 = tpu.matmul %52, %53, %cst_6 {dimension_numbers = #tpu.dot_dimension_numbers<[1], [0], [0], [1], [0, 0, 1, 1], [], []>, precision = #tpu.contract_precision<fp32>} : vector<8x128xf32>, vector<128x128xf32>, vector<8x128xf32> -> vector<8x128xf32>
    %c0_7 = arith.constant 0 : index
    %c0_8 = arith.constant 0 : index
    %55 = vector.load %arg4[%c0_7, %c0_8] : memref<1x128xf32, #tpu.memory_space<vmem>>, vector<1x128xf32>
    %56 = vector.broadcast %55 : vector<1x128xf32> to vector<8x128xf32>
    %57 = arith.addf %54, %56 : vector<8x128xf32>
    %c0_9 = arith.constant 0 : index
    %c0_10 = arith.constant 0 : index
    %58 = vector.load %arg5[%c0_9, %c0_10] : memref<8x128xf32, #tpu.memory_space<vmem>>, vector<8x128xf32>
    tpu.vector_store %arg5[%c0_9, %c0_10], %57 {strides = array<i32>} : memref<8x128xf32, #tpu.memory_space<vmem>>, vector<8x128xf32>,
    return
  }
  func.func @transform_0(%arg0: i32) -> (i32, i32) {
    %c0_i32 = arith.constant 0 : i32
    %c0_i32_0 = arith.constant 0 : i32
    return %arg0, %c0_i32 : i32, i32
  }
  func.func @transform_1(%arg0: i32) -> (i32, i32) {
    %c0_i32 = arith.constant 0 : i32
    %c0_i32_0 = arith.constant 0 : i32
    %c0_i32_1 = arith.constant 0 : i32
    return %c0_i32, %c0_i32_0 : i32, i32
  }
  func.func @transform_2(%arg0: i32) -> (i32, i32) {
    %c0_i32 = arith.constant 0 : i32
    %c0_i32_0 = arith.constant 0 : i32
    %c0_i32_1 = arith.constant 0 : i32
    return %c0_i32, %c0_i32_0 : i32, i32
  }
  func.func @transform_3(%arg0: i32) -> (i32, i32) {
    %c0_i32 = arith.constant 0 : i32
    %c0_i32_0 = arith.constant 0 : i32
    %c0_i32_1 = arith.constant 0 : i32
    return %c0_i32, %c0_i32_0 : i32, i32
  }
  func.func @transform_4(%arg0: i32) -> (i32, i32) {
    %c0_i32 = arith.constant 0 : i32
    %c0_i32_0 = arith.constant 0 : i32
    return %arg0, %c0_i32 : i32, i32
  }
}

</mosaic_0001>

<bundles_post_ra>
// kernel: tpu_custom_call.1
= control target key start
LH: loop header
LB: loop body
LE: loop exit
PB: predicated region body
PF: predicated region fallthrough
CT: control target
= control target key end

     0   :  { %9 = vsyncpa [#allocation3], 0  ;;  %s2750_s0 = inlined_call_operand.hbm [shape: s32[8,8], index: 0, kind: input, shape index: {}]   ;;  %s2751_s1 = inlined_call_operand.hbm [shape: f32[64,128], index: 1, kind: input, shape index: {}]   ;;  %s2752_s2 = inlined_call_operand.hbm [shape: f32[128,128], index: 2, kind: input, shape index: {}]   ;;  %s2753_s3 = inlined_call_operand.vmem [shape: f32[1,128], index: 3, kind: input, shape index: {}]   ;;  %s2754_s4 = inlined_call_operand.hbm [shape: f32[8,128], index: 4, kind: output, shape index: {}]  }
   0x1   :  { %10 = vsyncpa [#allocation6], 0 }
   0x2   :  { %11 = vsyncpa [#allocation4], 0  ;;  %s2191_s15 = smov [#allocation5]   ;;  %s2097_s19 = scalar_lea.hbm %s2751_s1, 1024 }
   0x3   :  { %s27_s16 = sshll.u32 %s2191_s15, 4  ;;  %p2098_p0 = scmp.ne.s32.totalorder %s2751_s1, %s2097_s19  ;;  %s28_s16 = int_to_ptr.vmem [resolvable:$true] %s27_s16 }
   0x4   :  { %p2101_p1 = scmp.lt.u32.totalorder %s2097_s19, %s2751_s1 }
   0x6   :  { %p2103_p2 = pnand %p2101_p1, %p2098_p0 }
   0x8   :  { %2106 = shalt.err (!%p2103_p2)
}
   0x9   :  { %s2107_s24 = scalar_lea.vmem %s28_s16, 1024  ;;  %p2112_p4 = scmp.lt.s32.totalorder %s28_s16, %s28_s16 }
   0xa   :  { %p2108_p3 = scmp.ne.s32.totalorder %s28_s16, %s2107_s24  ;;  %p2113_p5 = scmp.lt.s32.totalorder %s2107_s24, %s2107_s24 }
   0xc   :  { %p2114_p6 = por %p2113_p5, %p2112_p4 }
   0xe   :  { %p2115_p7 = pnand %p2114_p6, %p2108_p3 }
  0x10   :  { %2118 = shalt.err (!%p2115_p7)
}
  0x11   :  { %s2192_s25 = smov 128   ;;  %s2193_s26 = smov 8  }
  0x12   :  { %33 = dma.hbm_to_vmem [thread:$0]  %s2751_s1, 1024, %s28_s16, [#allocation6], %s2192_s25, %s2192_s25, %s2193_s26  }
  0x13   :  { %s2194_s29 = smov [#allocation2]   ;;  %s2195_s5 = smov [#allocation7]  }
  0x14   :  { %s18_s30 = sshll.u32 %s2194_s29, 4  ;;  %s39_s6 = sshll.u32 %s2195_s5, 4  ;;  %s19_s30 = int_to_ptr.vmem [resolvable:$true] %s18_s30  ;;  %s40_s6 = int_to_ptr.vmem [resolvable:$true] %s39_s6 }
  0x15   :  { %s2119_s9 = scalar_lea.hbm %s2750_s0, 128 }
  0x16   :  { %p2120_p8 = scmp.ne.s32.totalorder %s2750_s0, %s2119_s9  ;;  %p2123_p9 = scmp.lt.u32.totalorder %s2119_s9, %s2750_s0 }
  0x18   :  { %p2125_p10 = pnand %p2123_p9, %p2120_p8 }
  0x1a   :  { %2128 = shalt.err (!%p2125_p10)
}
  0x1b   :  { %s2129_s1 = scalar_lea.vmem %s19_s30, 128  ;;  %p2134_p12 = scmp.lt.s32.totalorder %s19_s30, %s19_s30 }
  0x1c   :  { %p2130_p11 = scmp.ne.s32.totalorder %s19_s30, %s2129_s1  ;;  %p2135_p13 = scmp.lt.s32.totalorder %s2129_s1, %s2129_s1 }
  0x1e   :  { %p2136_p0 = por %p2135_p13, %p2134_p12 }
  0x20   :  { %p2137_p1 = pnand %p2136_p0, %p2130_p11 }
  0x22   :  { %2140 = shalt.err (!%p2137_p1)
}
  0x23   :  { %21 = dma.hbm_to_vmem [thread:$0]  %s2750_s0, 128, %s19_s30, [#allocation3]  }
  0x24   :  { %s2141_s18 = scalar_lea.hbm %s2752_s2, 2048 }
  0x25   :  { %p2142_p2 = scmp.ne.s32.totalorder %s2752_s2, %s2141_s18  ;;  %p2145_p3 = scmp.lt.u32.totalorder %s2141_s18, %s2752_s2 }
  0x27   :  { %p2147_p4 = pnand %p2145_p3, %p2142_p2 }
  0x29   :  { %2150 = shalt.err (!%p2147_p4)
}
  0x2a   :  { %s2151_s23 = scalar_lea.vmem %s40_s6, 2048  ;;  %p2156_p6 = scmp.lt.s32.totalorder %s40_s6, %s40_s6 }
  0x2b   :  { %p2152_p5 = scmp.ne.s32.totalorder %s40_s6, %s2151_s23  ;;  %p2157_p7 = scmp.lt.s32.totalorder %s2151_s23, %s2151_s23 }
  0x2d   :  { %p2158_p8 = por %p2157_p7, %p2156_p6 }
  0x2f   :  { %p2159_p9 = pnand %p2158_p8, %p2152_p5 }
  0x31   :  { %2162 = shalt.err (!%p2159_p9)
}
  0x32   :  { %45 = dma.hbm_to_vmem [thread:$0]  %s2752_s2, 2048, %s40_s6, [#allocation6], %s2192_s25, %s2192_s25, %s2193_s26  }
  0x33   :  { %2185 = dma.done.wait [#allocation3], 128  }
  0x34   :  { %2186 = vsyncadd [#allocation3], 4294967168 }
  0x35   :  { %2187 = dma.done.wait [#allocation6], 3072  }
  0x36   :  { %2188 = vsyncadd [#allocation6], 4294964224  ;;  %v2196_v0 = vmov 2   ;;  %v2197_v1 = vmov 0   ;;  %v57_v2 = vld [vmem:[#allocation2] sm:$0xff]  ;;  %v2198_v3 = vmov 3  }
  0x37   :  { %2090 = vset.pattern.permute.xlu1 %v2196_v0  ;;  %2088 = vset.pattern.permute.xlu0 %v2197_v1  ;;  %v2199_v4 = vmov 1   ;;  %v2200_v5 = vmov 4   ;;  %v2201_v6 = vmov 5   ;;  %v2202_v7 = vmov 6   ;;  %v116_v8 = vld [vmem:[#allocation5] sm:$0xff]  ;;  %v117_v9 = vld [vmem:[#allocation5 + $0x8] sm:$0xff] }
  0x38   :  { %75 = vperm.xlu1 %2090, %v57_v2   ;;  %61 = vperm.xlu0 %2088, %v57_v2   ;;  %v2203_v10 = vmov 7   ;;  %v129_v11 = vand.u32 4294901760, %v116_v8  ;;  %v132_v12 = vand.u32 4294901760, %v117_v9  ;;  %v2772_v16 = vmov 0.0|0.0   ;;  %v118_v17 = vld [vmem:[#allocation5 + $0x10] sm:$0xff]  ;;  %v119_v18 = vld [vmem:[#allocation5 + $0x18] sm:$0xff] }
  0x39   :  { %1835 = vmatprep.subr.bf16.mxu0 %v2772_v16  ;;  %1931 = vmatprep.subr.bf16.mxu1 %v2772_v16  ;;  %v135_v19 = vand.u32 4294901760, %v118_v17  ;;  %v138_v20 = vand.u32 4294901760, %v119_v18  ;;  %v120_v22 = vld [vmem:[#allocation5 + $0x20] sm:$0xff]  ;;  %v121_v23 = vld [vmem:[#allocation5 + $0x28] sm:$0xff]  ;;  %v122_v27 = vld [vmem:[#allocation5 + $0x30] sm:$0xff]  ;;  %vm2205_vm0 = vmmov 0  }
  0x3a   :  { %v2275_v13 = vpack.c.bf16 %v132_v12, %v129_v11  ;;  %v2277_v14 = vsub.f32 %v116_v8, %v129_v11  ;;  %v2279_v15 = vsub.f32 %v117_v9, %v132_v12  ;;  %v141_v24 = vand.u32 4294901760, %v120_v22  ;;  %v123_v28 = vld [vmem:[#allocation5 + $0x38] sm:$0xff]  ;;  %v665_v12 = vld [vmem:[#allocation7] sm:$0xff]  ;;  %s2207_s26 = smov [#allocation8]  }
  0x3b   :  { %v2285_v21 = vpack.c.bf16 %v138_v20, %v135_v19  ;;  %v144_v25 = vand.u32 4294901760, %v121_v23  ;;  %v2291_v29 = vsub.f32 %v118_v17, %v135_v19  ;;  %v2293_v30 = vsub.f32 %v119_v18, %v138_v20  ;;  %v666_v17 = vld [vmem:[#allocation7 + $0x8] sm:$0xff]  ;;  %v667_v18 = vld [vmem:[#allocation7 + $0x10] sm:$0xff]  ;;  %s1336_s27 = sshll.u32 %s2207_s26, 4  ;;  %s1337_s27 = int_to_ptr.vmem [resolvable:$true] %s1336_s27 }
  0x3c   :  { %2091 = vset.pattern.permute.xlu1 %v2198_v3  ;;  %2089 = vset.pattern.permute.xlu0 %v2199_v4  ;;  %v2296_v31 = vsub.f32 %v120_v22, %v141_v24  ;;  %v147_v33 = vand.u32 4294901760, %v122_v27  ;;  %v150_v34 = vand.u32 4294901760, %v123_v28  ;;  %v214_v35 = vand.u32 4294901760, %v2277_v14  ;;  %v668_v22 = vld [vmem:[#allocation7 + $0x18] sm:$0xff]  ;;  %s2163_s28 = scalar_lea.vmem %s1337_s27, 128  ;;  %p2168_p11 = scmp.lt.s32.totalorder %s1337_s27, %s1337_s27 }
  0x3d   :  { %82 = vperm.xlu1 %2091, %v57_v2   ;;  %68 = vperm.xlu0 %2089, %v57_v2   ;;  %v2289_v26 = vpack.c.bf16 %v144_v25, %v141_v24  ;;  %v2298_v32 = vsub.f32 %v121_v23, %v144_v25  ;;  %v2206_v36 = vmov 0.0   ;;  %v221_v37 = vand.u32 4294901760, %v2279_v15  ;;  %v2353_v24 = vld [vmem:[#allocation7 + $0x20] sm:$0xff]  ;;  %v670_v25 = vld [vmem:[#allocation7 + $0x28] sm:$0xff]  ;;  %p2164_p10 = scmp.ne.s32.totalorder %s1337_s27, %s2163_s28  ;;  %p2169_p12 = scmp.lt.s32.totalorder %s2163_s28, %s2163_s28 }
  0x3e   :  { %1837 = vmatpush3.bf16.msra.mxu0 %v2275_v13  ;;  %1527 = vmatprep.mubr.msk.f32.mxu0 %vm2205_vm0, %v2206_v36  ;;  %v2307_v38 = vpack.c.bf16 %v150_v34, %v147_v33  ;;  %v2309_v39 = vsub.f32 %v122_v27, %v147_v33  ;;  %v2311_v40 = vsub.f32 %v123_v28, %v150_v34  ;;  %v228_v44 = vand.u32 4294901760, %v2291_v29 }
  0x3f   :  { %1838 = vmatprep.subr.bf16.mxu0 %v2772_v16  ;;  %1692 = vmatprep.mubr.msk.f32.mxu1 %vm2205_vm0, %v2206_v36  ;;  %v215_v41 = vsub.f32 %v2277_v14, %v214_v35  ;;  %v222_v42 = vsub.f32 %v2279_v15, %v221_v37  ;;  %v235_v45 = vand.u32 4294901760, %v2293_v30  ;;  %v242_v52 = vand.u32 4294901760, %v2296_v31  ;;  %p2170_p13 = por %p2169_p12, %p2168_p11 }
  0x40   :  { %v229_v47 = vsub.f32 %v2291_v29, %v228_v44  ;;  %v249_v53 = vand.u32 4294901760, %v2298_v32  ;;  %v256_v59 = vand.u32 4294901760, %v2309_v39  ;;  %v263_v60 = vand.u32 4294901760, %v2311_v40 }
  0x41   :  { %2092 = vset.pattern.permute.xlu1 %v2200_v5  ;;  %2093 = vset.pattern.permute.xlu0 %v2201_v6  ;;  %v216_v43 = vand.u32 4294901760, %v215_v41  ;;  %v223_v46 = vand.u32 4294901760, %v222_v42  ;;  %v236_v48 = vsub.f32 %v2293_v30, %v235_v45  ;;  %v243_v55 = vsub.f32 %v2296_v31, %v242_v52  ;;  %v2471_v5 = vld [vmem:[#allocation7 + $0x70] sm:$0xff]  ;;  %p2171_p0 = pnand %p2170_p13, %p2164_p10 }
  0x42   :  { %89 = vperm.xlu1 %2092, %v57_v2   ;;  %96 = vperm.xlu0 %2093, %v57_v2   ;;  %v230_v50 = vand.u32 4294901760, %v229_v47  ;;  %v250_v56 = vsub.f32 %v2298_v32, %v249_v53  ;;  %v257_v62 = vsub.f32 %v2309_v39, %v256_v59  ;;  %v264_v63 = vsub.f32 %v2311_v40, %v263_v60 }
  0x43   :  { %1840 = vmatpush3.bf16.msra.mxu0 %v2285_v21  ;;  %v2321_v49 = vpack.c.bf16 %v223_v46, %v216_v43  ;;  %v237_v51 = vand.u32 4294901760, %v236_v48  ;;  %v244_v57 = vand.u32 4294901760, %v243_v55  ;;  %v2347_v8 = vpack.c.bf16 %v235_v45, %v228_v44 }
  0x44   :  { %1841 = vmatprep.subr.bf16.mxu0 %v2772_v16  ;;  %v251_v58 = vand.u32 4294901760, %v250_v56  ;;  %v258_v0 = vand.u32 4294901760, %v257_v62  ;;  %v265_v1 = vand.u32 4294901760, %v264_v63  ;;  %v2349_v9 = vpack.c.bf16 %v249_v53, %v242_v52 }
  0x45   :  { %v2325_v54 = vpack.c.bf16 %v237_v51, %v230_v50  ;;  %v58_v11 = vlaneseq  ;;  %v689_v19 = vand.u32 4294901760, %v665_v12  ;;  %v692_v20 = vand.u32 4294901760, %v666_v17 }
  0x46   :  { %2094 = vset.pattern.permute.xlu1 %v2202_v7  ;;  %2096 = vset.pattern.permute.xlu0 %v2203_v10  ;;  %v2331_v61 = vpack.c.bf16 %v251_v58, %v244_v57  ;;  %v2345_v7 = vpack.c.bf16 %v221_v37, %v214_v35  ;;  %v695_v23 = vand.u32 4294901760, %v667_v18  ;;  %v698_v28 = vand.u32 4294901760, %v668_v22  ;;  %v2358_v35 = vld [vmem:[#allocation7 + $0x30] sm:$0xff]  ;;  %v2360_v37 = vld [vmem:[#allocation7 + $0x38] sm:$0xff] }
  0x47   :  { %103 = vperm.xlu1 %2094, %v57_v2   ;;  %1843 = vmatpush3.bf16.msra.mxu0 %v2289_v26  ;;  %v2355_v27 = vand.u32 127, %v58_v11  ;;  %v701_v33 = vand.u32 4294901760, %v2353_v24  ;;  %v704_v34 = vand.u32 4294901760, %v670_v25  ;;  %v2362_v41 = vsub.f32 %v665_v12, %v689_v19 }
  0x48   :  { %1844 = vmatprep.subr.bf16.mxu0 %v2772_v16  ;;  %v2364_v42 = vsub.f32 %v666_v17, %v692_v20  ;;  %v2366_v43 = vsub.f32 %v667_v18, %v695_v23  ;;  %v2368_v44 = vpack.c.bf16 %v692_v20, %v689_v19  ;;  %v2370_v45 = vsub.f32 %v668_v22, %v698_v28  ;;  %v673_v17 = vld [vmem:[#allocation7 + $0x40] sm:$0xff] }
  0x49   :  { %v2373_v46 = vsub.f32 %v2353_v24, %v701_v33  ;;  %v2375_v47 = vsub.f32 %v670_v25, %v704_v34  ;;  %v707_v48 = vand.u32 4294901760, %v2358_v35  ;;  %v2760_v50 = vand.u32 4294901760, %v2362_v41  ;;  %v674_v24 = vld [vmem:[#allocation7 + $0x48] sm:$0xff] }
  0x4a   :  { %v2759_v51 = vand.u32 4294901760, %v2364_v42  ;;  %v2758_v52 = vand.u32 4294901760, %v2366_v43  ;;  %v710_v53 = vand.u32 4294901760, %v2360_v37  ;;  %v2756_v55 = vand.u32 4294901760, %v2370_v45 }
  0x4b   :  { %2095 = vset.pattern.permute.xlu1 %v2203_v10  ;;  %1846 = vmatpush3.bf16.msra.mxu0 %v2307_v38  ;;  %v2351_v10 = vpack.c.bf16 %v263_v60, %v256_v59  ;;  %v2755_v56 = vand.u32 4294901760, %v2373_v46  ;;  %v2757_v57 = vand.u32 4294901760, %v2375_v47  ;;  %v2386_v58 = vsub.f32 %v2358_v35, %v707_v48 }
  0x4c   :  { %110 = vperm.xlu1 %2095, %v57_v2   ;;  %1847 = vmatprep.subr.bf16.mxu0 %v2772_v16  ;;  %v2335_v2 = vpack.c.bf16 %v265_v1, %v258_v0  ;;  %v783_v59 = vsub.f32 %v2362_v41, %v2760_v50  ;;  %v790_v60 = vsub.f32 %v2364_v42, %v2759_v51  ;;  %v716_v6 = vand.u32 4294901760, %v674_v24 }
  0x4d   :  { %v797_v62 = vsub.f32 %v2366_v43, %v2758_v52  ;;  %v2398_v63 = vsub.f32 %v2360_v37, %v710_v53  ;;  %v804_v0 = vsub.f32 %v2370_v45, %v2756_v55  ;;  %v811_v1 = vsub.f32 %v2373_v46, %v2755_v56 }
  0x4e   :  { %v818_v11 = vsub.f32 %v2375_v47, %v2757_v57  ;;  %v2762_v12 = vand.u32 4294901760, %v2386_v58  ;;  %v784_v18 = vand.u32 4294901760, %v783_v59  ;;  %v791_v19 = vand.u32 4294901760, %v790_v60 }
  0x4f   :  { %v798_v20 = vand.u32 4294901760, %v797_v62  ;;  %v2761_v22 = vand.u32 4294901760, %v2398_v63  ;;  %v805_v25 = vand.u32 4294901760, %v804_v0  ;;  %v812_v35 = vand.u32 4294901760, %v811_v1  ;;  %v2419_v0 = vld [vmem:[#allocation7 + $0x50] sm:$0xff]  ;;  %v2421_v1 = vld [vmem:[#allocation7 + $0x58] sm:$0xff] }
  0x50   :  { %v819_v37 = vand.u32 4294901760, %v818_v11  ;;  %v825_v56 = vsub.f32 %v2386_v58, %v2762_v12  ;;  %v1932_v55 = vpack.c.bf16 %v791_v19, %v784_v18  ;;  %v2417_v52 = vpack.c.bf16 %v698_v28, %v695_v23 }
  0x51   :  { %v832_v57 = vsub.f32 %v2398_v63, %v2761_v22  ;;  %v713_v59 = vand.u32 4294901760, %v673_v17  ;;  %v1935_v51 = vpack.c.bf16 %v805_v25, %v798_v20  ;;  %v2429_v19 = vsub.f32 %v674_v24, %v716_v6  ;;  %v2433_v25 = vld [vmem:[#allocation7 + $0x60] sm:$0xff] }
  0x52   :  { %v1938_v50 = vpack.c.bf16 %v819_v37, %v812_v35  ;;  %1933 = vmatpush3.bf16.msra.mxu1 %v1932_v55  ;;  %v826_v11 = vand.u32 4294901760, %v825_v56  ;;  %v2431_v20 = vpack.c.bf16 %v704_v34, %v701_v33  ;;  %v2435_v35 = vld [vmem:[#allocation7 + $0x68] sm:$0xff]  ;;  %v2764_v56 = vand.u32 4294901760, %v2419_v0 }
  0x53   :  { %v2425_v18 = vsub.f32 %v673_v17, %v713_v59  ;;  %1934 = vmatprep.subr.bf16.mxu1 %v2772_v16  ;;  %v833_v28 = vand.u32 4294901760, %v832_v57  ;;  %2784 = vst [vmem:[#allocation12_spill] sm:$0xff] %v2429_v19  ;;  %v2765_v17 = vand.u32 4294901760, %v2421_v1  ;;  %v2767_v57 = vand.u32 4294901760, %v2433_v25 }
  0x54   :  { %v2769_v33 = vand.u32 4294901760, %v2435_v35  ;;  %v2452_v12 = vsub.f32 %v2419_v0, %v2764_v56  ;;  %vm124_vm9 = vcmask 523264  }
  0x55   :  { %v2763_v55 = vand.u32 4294901760, %v2425_v18  ;;  %v2469_v56 = vsub.f32 %v2433_v25, %v2767_v57 }
  0x56   :  { %1936 = vmatpush3.bf16.msra.mxu1 %v1935_v51  ;;  %2785 = vst [vmem:[#allocation13_spill] sm:$0xff] %v2452_v12  ;;  %v1941_v51 = vpack.c.bf16 %v833_v28, %v826_v11  ;;  %v2768_v11 = vand.u32 4294901760, %v2452_v12 }
  0x57   :  { %v839_v22 = vsub.f32 %v2425_v18, %v2763_v55  ;;  %1937 = vmatprep.subr.bf16.mxu1 %v2772_v16  ;;  %2787 = vst [vmem:[#allocation15_spill] sm:$0xff] %v2469_v56 }
  0x58   :  { %v853_v57 = vsub.f32 %v2452_v12, %v2768_v11 }
  0x5a   :  { %1939 = vmatpush3.bf16.msra.mxu1 %v1938_v50  ;;  %v854_v12 = vand.u32 4294901760, %v853_v57 }
  0x5b   :  { %1940 = vmatprep.subr.bf16.mxu1 %v2772_v16 }
  0x5e   :  { %1942 = vmatpush3.bf16.msra.mxu1 %v1941_v51 }
  0xb7   :  { %v76_v60 = vpop.permute.xlu1 %75  ;;  %v62_v62 = vpop.permute.xlu0 %61 }
  0xb8   :  { %vm77_vm1 = vcmp.eq.s32.totalorder %v76_v60, %v2355_v27  ;;  %vm63_vm2 = vcmp.eq.s32.totalorder %v62_v62, %v2355_v27  ;;  %v2766_v60 = vand.u32 4294901760, %v2429_v19  ;;  %v2442_v62 = vpack.c.bf16 %v710_v53, %v707_v48 }
  0xb9   :  { %v1348_v23 = vsel %vm77_vm1, 1.0, %v2206_v36  ;;  %v1346_v37 = vsel %vm63_vm2, 1.0, %v2206_v36  ;;  %v2457_v48 = vsub.f32 %v2421_v1, %v2765_v17  ;;  %v2459_v53 = vpack.c.bf16 %v716_v6, %v713_v59  ;;  %v2473_v17 = vld [vmem:[#allocation7 + $0x78] sm:$0xff] }
  0xba   :  { %v846_v55 = vsub.f32 %v2429_v19, %v2766_v60  ;;  %v840_v59 = vand.u32 4294901760, %v839_v22 }
  0xbb   :  { %2786 = vst [vmem:[#allocation14_spill] sm:$0xff] %v2457_v48  ;;  %v2789_v50 = vand.u32 4294901760, %v2457_v48 }
  0xbc   :  { %v83_v34 = vpop.permute.xlu1 %82  ;;  %v69_v24 = vpop.permute.xlu0 %68 }
  0xbd   :  { %vm70_vm3 = vcmp.eq.s32.totalorder %v69_v24, %v2355_v27  ;;  %vm84_vm4 = vcmp.eq.s32.totalorder %v83_v34, %v2355_v27  ;;  %v847_v24 = vand.u32 4294901760, %v846_v55  ;;  %v2486_v34 = vsub.f32 %v2435_v35, %v2769_v33 }
  0xbe   :  { %v1347_v6 = vsel %vm70_vm3, 1.0, %v2206_v36  ;;  %v860_v11 = vsub.f32 %v2457_v48, %v2789_v50 }
  0xbf   :  { %v73_v28 = vadd.f32 %v1347_v6, %v1346_v37  ;;  %2788 = vst [vmem:[#allocation16_spill] sm:$0xff] %v2486_v34  ;;  %v1349_v37 = vsel %vm84_vm4, 1.0, %v2206_v36  ;;  %v1944_v33 = vpack.c.bf16 %v847_v24, %v840_v59  ;;  %v2774_v22 = vand.u32 4294901760, %v2486_v34 }
  0xc0   :  { %v861_v16 = vand.u32 4294901760, %v860_v11  ;;  %v2792_v59 = vand.u32 4294901760, %v2473_v17 }
  0xc1   :  { %v80_v55 = vadd.f32 %v1348_v23, %v73_v28  ;;  %v90_v6 = vpop.permute.xlu1 %89  ;;  %v97_v60 = vpop.permute.xlu0 %96  ;;  %v2790_v23 = vand.u32 4294901760, %v2469_v56  ;;  %v874_v50 = vsub.f32 %v2486_v34, %v2774_v22 }
  0xc2   :  { %vm91_vm5 = vcmp.eq.s32.totalorder %v90_v6, %v2355_v27  ;;  %vm98_vm6 = vcmp.eq.s32.totalorder %v97_v60, %v2355_v27  ;;  %v2791_v6 = vand.u32 4294901760, %v2471_v5  ;;  %v2513_v24 = vsub.f32 %v2473_v17, %v2792_v59 }
  0xc3   :  { %v87_v4 = vadd.f32 %v1349_v37, %v80_v55  ;;  %v1350_v3 = vsel %vm91_vm5, 1.0, %v2206_v36  ;;  %v867_v28 = vsub.f32 %v2469_v56, %v2790_v23  ;;  %v1351_v37 = vsel %vm98_vm6, 1.0, %v2206_v36 }
  0xc4   :  { %v2508_v60 = vsub.f32 %v2471_v5, %v2791_v6  ;;  %v2793_v55 = vmov 0.0|0.0   ;;  %v2783_v23 = vand.u32 4294901760, %v2513_v24  ;;  %v875_v6 = vand.u32 4294901760, %v874_v50 }
  0xc5   :  { %v94_v57 = vadd.f32 %v1350_v3, %v87_v4  ;;  %1943 = vmatprep.subr.bf16.mxu1 %v2793_v55  ;;  %v868_v22 = vand.u32 4294901760, %v867_v28  ;;  %v1947_v56 = vpack.c.bf16 %v861_v16, %v854_v12 }
  0xc6   :  { %v104_v51 = vpop.permute.xlu1 %103  ;;  %v880_v11 = vand.u32 4294901760, %v2508_v60  ;;  %1945 = vmatpush3.bf16.msra.mxu1 %v1944_v33  ;;  %v888_v4 = vsub.f32 %v2513_v24, %v2783_v23 }
  0xc7   :  { %vm105_vm7 = vcmp.eq.s32.totalorder %v104_v51, %v2355_v27  ;;  %v101_v34 = vadd.f32 %v1351_v37, %v94_v57  ;;  %1946 = vmatprep.subr.bf16.mxu1 %v2793_v55  ;;  %v1950_v19 = vpack.c.bf16 %v875_v6, %v868_v22  ;;  %v2808_v6 = vld [vmem:[#allocation16_spill] sm:$0xff] }
  0xc8   :  { %v881_v3 = vsub.f32 %v2508_v60, %v880_v11  ;;  %v1352_v59 = vsel %vm105_vm7, 1.0, %v2206_v36  ;;  %v889_v16 = vand.u32 4294901760, %v888_v4  ;;  %v1977_v4 = vpack.c.bf16 %v2513_v24, %v2508_v60 }
  0xc9   :  { %v108_v51 = vadd.f32 %v1352_v59, %v101_v34  ;;  %v2809_v59 = vand.u32 4294901760, %v2362_v41 }
  0xca   :  { %1948 = vmatpush3.bf16.msra.mxu1 %v1947_v56  ;;  %v882_v33 = vand.u32 4294901760, %v881_v3 }
  0xcb   :  { %v111_v48 = vpop.permute.xlu1 %110  ;;  %1949 = vmatprep.subr.bf16.mxu1 %v2793_v55 }
  0xcc   :  { %vm112_vm8 = vcmp.eq.s32.totalorder %v111_v48, %v2355_v27  ;;  %v1953_v57 = vpack.c.bf16 %v889_v16, %v882_v33  ;;  %v2806_v48 = vld [vmem:[#allocation14_spill] sm:$0xff]  ;;  %v2811_v16 = vand.u32 4294901760, %v2366_v43 }
  0xcd   :  { %v1353_v12 = vsel %vm112_vm8, 1.0, %v2206_v36 }
  0xce   :  { %v115_v28 = vadd.f32 %v1353_v12, %v108_v51  ;;  %1951 = vmatpush3.bf16.msra.mxu1 %v1950_v19  ;;  %v1965_v19 = vpack.c.bf16 %v2398_v63, %v2386_v58  ;;  %v2810_v51 = vand.u32 4294901760, %v2364_v42  ;;  %v2812_v12 = vand.u32 4294901760, %v2370_v45 }
  0xcf   :  { %1952 = vmatprep.subr.bf16.mxu1 %v2793_v55 }
  0xd0   :  { %v126_v50 = vsel %vm124_vm9, %v115_v28, 0  ;;  %v2004_v33 = vpack.c.bf16 %v2810_v51, %v2809_v59  ;;  %v2007_v28 = vpack.c.bf16 %v2812_v12, %v2811_v16 }
  0xd1   :  { %v201_v37 = vand.u32 4294901760, %v126_v50 }
  0xd2   :  { %1954 = vmatpush3.bf16.msra.mxu1 %v1953_v57  ;;  %v2815_v57 = vand.u32 4294901760, %v2386_v58 }
  0xd3   :  { %v202_v23 = vsub.f32 %v126_v50, %v201_v37  ;;  %1955 = vmatprep.subr.bf16.mxu1 %v2793_v55 }
  0xd5   :  { %v203_v34 = vand.u32 4294901760, %v202_v23 }
  0xd7   :  { %v204_v27 = vsub.f32 %v202_v23, %v203_v34 }
  0xd9   :  { %v205_v56 = vand.u32 4294901760, %v204_v27 }
  0xdb   :  { %1528 = vmatmul.mubr.f32.vlgmr.msra.gmra.mrb[0].mxu0 %v205_v56 }
  0xdc   :  { %1849 = vmatpush3.bf16.msra.mxu0 %v2321_v49  ;;  %1546 = vmatprep.mubr.msk.f32.mxu0 %vm2205_vm0, %v2206_v36  ;;  %v2794_v49 = vpack.c.bf16 %v2279_v15, %v2277_v14  ;;  %v2797_v14 = vpack.c.bf16 %v2311_v40, %v2309_v39  ;;  %v2799_v15 = vand.u32 4294901760, %v2421_v1  ;;  %v1956_v40 = vpack.c.bf16 %v2364_v42, %v2362_v41 }
  0xdd   :  { %1850 = vmatprep.subr.bf16.mxu0 %v2793_v55  ;;  %v2813_v41 = vand.u32 4294901760, %v2373_v46  ;;  %v2814_v42 = vand.u32 4294901760, %v2375_v47 }
  0xdf   :  { %v2010_v50 = vpack.c.bf16 %v2814_v42, %v2813_v41 }
  0xe0   :  { %1852 = vmatpush3.bf16.msra.mxu0 %v2325_v54  ;;  %v2795_v54 = vpack.c.bf16 %v2293_v30, %v2291_v29  ;;  %v2801_v29 = vand.u32 4294901760, %v2435_v35 }
  0xe1   :  { %1853 = vmatprep.subr.bf16.mxu0 %v2793_v55 }
  0xe4   :  { %1855 = vmatpush3.bf16.msra.mxu0 %v2331_v61  ;;  %v2796_v61 = vpack.c.bf16 %v2298_v32, %v2296_v31  ;;  %v2802_v31 = vand.u32 4294901760, %v2471_v5  ;;  %v2803_v32 = vand.u32 4294901760, %v2473_v17  ;;  %v1959_v5 = vpack.c.bf16 %v2370_v45, %v2366_v43  ;;  %v2805_v17 = vld [vmem:[#allocation13_spill] sm:$0xff] }
  0xe5   :  { %1856 = vmatprep.subr.bf16.mxu0 %v2793_v55  ;;  %v1971_v22 = vpack.c.bf16 %v2806_v48, %v2805_v17  ;;  %v2816_v43 = vand.u32 4294901760, %v2398_v63  ;;  %v2822_v63 = vand.u32 4294901760, %v2808_v6 }
  0xe7   :  { %v2013_v45 = vpack.c.bf16 %v2816_v43, %v2815_v57 }
  0xe8   :  { %1858 = vmatpush3.bf16.msra.mxu0 %v2335_v2 }
  0xe9   :  { %1859 = vmatprep.subr.bf16.mxu0 %v2793_v55 }
  0xeb   :  { %1547 = vmatmul.mubr.f32.vlgmr.msra.gmra.mrb[0].mxu0 %v201_v37 }
  0xec   :  { %1861 = vmatpush3.bf16.msra.mxu0 %v2794_v49  ;;  %1565 = vmatprep.mubr.msk.f32.mxu0 %vm2205_vm0, %v2206_v36 }
  0xed   :  { %1862 = vmatprep.subr.bf16.mxu0 %v2793_v55 }
  0xf0   :  { %1864 = vmatpush3.bf16.msra.mxu0 %v2795_v54 }
  0xf1   :  { %1865 = vmatprep.subr.bf16.mxu0 %v2793_v55 }
  0xf4   :  { %1867 = vmatpush3.bf16.msra.mxu0 %v2796_v61 }
  0xf5   :  { %1868 = vmatprep.subr.bf16.mxu0 %v2793_v55 }
  0xf8   :  { %1870 = vmatpush3.bf16.msra.mxu0 %v2797_v14 }
  0xf9   :  { %1871 = vmatprep.subr.bf16.mxu0 %v2793_v55 }
  0xfb   :  { %1566 = vmatmul.mubr.f32.vlgmr.msra.gmra.mrb[0].mxu0 %v202_v23  ;;  %v2807_v23 = vld [vmem:[#allocation15_spill] sm:$0xff] }
  0xfc   :  { %1873 = vmatpush3.bf16.msra.mxu0 %v2275_v13  ;;  %1584 = vmatprep.mubr.msk.f32.mxu0 %vm2205_vm0, %v2206_v36  ;;  %v1974_v3 = vpack.c.bf16 %v2808_v6, %v2807_v23  ;;  %v2821_v58 = vand.u32 4294901760, %v2807_v23 }
  0xfd   :  { %1874 = vmatprep.subr.bf16.mxu0 %v2793_v55 }
  0xfe   :  { %v2022_v49 = vpack.c.bf16 %v2822_v63, %v2821_v58 }
 0x100   :  { %1876 = vmatpush3.bf16.msra.mxu0 %v2285_v21 }
 0x101   :  { %1877 = vmatprep.subr.bf16.mxu0 %v2793_v55 }
 0x104   :  { %1879 = vmatpush3.bf16.msra.mxu0 %v2289_v26 }
 0x105   :  { %1880 = vmatprep.subr.bf16.mxu0 %v2793_v55 }
 0x108   :  { %1882 = vmatpush3.bf16.msra.mxu0 %v2307_v38 }
 0x109   :  { %1883 = vmatprep.subr.bf16.mxu0 %v2793_v55 }
 0x10b   :  { %1585 = vmatmul.mubr.f32.vlgmr.msra.gmra.mrb[0].mxu0 %v203_v34 }
 0x10c   :  { %1885 = vmatpush3.bf16.msra.mxu0 %v2345_v7  ;;  %1603 = vmatprep.mubr.msk.f32.mxu0 %vm2205_vm0, %v2206_v36 }
 0x10d   :  { %1886 = vmatprep.subr.bf16.mxu0 %v2793_v55 }
 0x110   :  { %1888 = vmatpush3.bf16.msra.mxu0 %v2347_v8 }
 0x111   :  { %1889 = vmatprep.subr.bf16.mxu0 %v2793_v55 }
 0x114   :  { %1891 = vmatpush3.bf16.msra.mxu0 %v2349_v9 }
 0x115   :  { %1892 = vmatprep.subr.bf16.mxu0 %v2793_v55 }
 0x118   :  { %1894 = vmatpush3.bf16.msra.mxu0 %v2351_v10 }
 0x119   :  { %1895 = vmatprep.subr.bf16.mxu0 %v2793_v55 }
 0x11b   :  { %1604 = vmatmul.mubr.f32.vlgmr.msra.gmra.mrb[0].mxu0 %v201_v37 }
 0x11c   :  { %1897 = vmatpush3.bf16.msra.mxu0 %v2275_v13  ;;  %1622 = vmatprep.mubr.msk.f32.mxu0 %vm2205_vm0, %v2206_v36  ;;  %v2798_v13 = vand.u32 4294901760, %v2419_v0  ;;  %v1962_v0 = vpack.c.bf16 %v2375_v47, %v2373_v46  ;;  %v2819_v46 = vand.u32 4294901760, %v2805_v17  ;;  %v2820_v47 = vand.u32 4294901760, %v2806_v48 }
 0x11d   :  { %1898 = vmatprep.subr.bf16.mxu0 %v2793_v55 }
 0x11e   :  { %v2019_v56 = vpack.c.bf16 %v2820_v47, %v2819_v46 }
 0x120   :  { %1900 = vmatpush3.bf16.msra.mxu0 %v2285_v21  ;;  %v2607_v21 = vpack.c.bf16 %v2799_v15, %v2798_v13 }
 0x121   :  { %1901 = vmatprep.subr.bf16.mxu0 %v2793_v55 }
 0x124   :  { %1903 = vmatpush3.bf16.msra.mxu0 %v2289_v26  ;;  %v2800_v26 = vand.u32 4294901760, %v2433_v25  ;;  %v2804_v25 = vld [vmem:[#allocation12_spill] sm:$0xff] }
 0x125   :  { %1904 = vmatprep.subr.bf16.mxu0 %v2793_v55  ;;  %v1968_v35 = vpack.c.bf16 %v2804_v25, %v2425_v18  ;;  %v2818_v34 = vand.u32 4294901760, %v2804_v25 }
 0x126   :  { %v2615_v30 = vpack.c.bf16 %v2801_v29, %v2800_v26 }
 0x128   :  { %1906 = vmatpush3.bf16.msra.mxu0 %v2307_v38  ;;  %v2623_v38 = vpack.c.bf16 %v2803_v32, %v2802_v31 }
 0x129   :  { %1907 = vmatprep.subr.bf16.mxu0 %v2793_v55 }
 0x12b   :  { %1623 = vmatmul.mubr.f32.vlgmr.msra.gmra.mrb[0].mxu0 %v201_v37  ;;  %v2817_v37 = vand.u32 4294901760, %v2425_v18  ;;  %v2823_v18 = vand.u32 4294901760, %v2513_v24 }
 0x12c   :  { %1909 = vmatpush3.bf16.msra.mxu0 %v2368_v44  ;;  %1657 = vmatprep.mubr.msk.f32.mxu0 %vm2205_vm0, %v2206_v36 }
 0x12d   :  { %1910 = vmatprep.subr.bf16.mxu0 %v2793_v55  ;;  %v2016_v27 = vpack.c.bf16 %v2818_v34, %v2817_v37  ;;  %v2025_v54 = vpack.c.bf16 %v2823_v18, %v880_v11 }
 0x130   :  { %1912 = vmatpush3.bf16.msra.mxu0 %v2417_v52 }
 0x131   :  { %1913 = vmatprep.subr.bf16.mxu0 %v2793_v55 }
 0x134   :  { %1915 = vmatpush3.bf16.msra.mxu0 %v2431_v20 }
 0x135   :  { %1916 = vmatprep.subr.bf16.mxu0 %v2793_v55 }
 0x138   :  { %1918 = vmatpush3.bf16.msra.mxu0 %v2442_v62 }
 0x139   :  { %1919 = vmatprep.subr.bf16.mxu0 %v2793_v55 }
 0x13c   :  { %1921 = vmatpush3.bf16.msra.mxu0 %v2459_v53 }
 0x13d   :  { %1922 = vmatprep.subr.bf16.mxu0 %v2793_v55 }
 0x140   :  { %1924 = vmatpush3.bf16.msra.mxu0 %v2607_v21 }
 0x141   :  { %1925 = vmatprep.subr.bf16.mxu0 %v2793_v55 }
 0x144   :  { %1927 = vmatpush3.bf16.msra.mxu0 %v2615_v30 }
 0x145   :  { %1928 = vmatprep.subr.bf16.mxu0 %v2793_v55 }
 0x148   :  { %1930 = vmatpush3.bf16.msra.mxu0 %v2623_v38 }
 0x1fe   :  { %v661_v39 = vpop.f32.mrb[0].mxu0 }
 0x1ff   :  { %v2628_v2 = vand.u32 4294901760, %v661_v39  ;;  %v1624_v7 = vpop.f32.mrb[1].mxu0 }
 0x201   :  { %v770_v8 = vsub.f32 %v661_v39, %v2628_v2  ;;  %1693 = vmatmul.mubr.f32.vlgmr.msra.gmra.mrb[0].mxu1 %v2628_v2 }
 0x202   :  { %1957 = vmatpush3.bf16.msra.mxu1 %v1956_v40  ;;  %1727 = vmatprep.mubr.msk.f32.mxu1 %vm2205_vm0, %v2206_v36 }
 0x203   :  { %v771_v9 = vand.u32 4294901760, %v770_v8  ;;  %1958 = vmatprep.subr.bf16.mxu1 %v2793_v55 }
 0x205   :  { %v772_v10 = vsub.f32 %v770_v8, %v771_v9 }
 0x206   :  { %1960 = vmatpush3.bf16.msra.mxu1 %v1959_v5 }
 0x207   :  { %v773_v1 = vand.u32 4294901760, %v772_v10  ;;  %1961 = vmatprep.subr.bf16.mxu1 %v2793_v55 }
 0x209   :  { %1658 = vmatmul.mubr.f32.vlgmr.msra.gmra.mrb[2].mxu0 %v773_v1 }
 0x20a   :  { %1963 = vmatpush3.bf16.msra.mxu1 %v1962_v0 }
 0x20b   :  { %1964 = vmatprep.subr.bf16.mxu1 %v2793_v55 }
 0x20e   :  { %1966 = vmatpush3.bf16.msra.mxu1 %v1965_v19 }
 0x20f   :  { %1967 = vmatprep.subr.bf16.mxu1 %v2793_v55 }
 0x212   :  { %1969 = vmatpush3.bf16.msra.mxu1 %v1968_v35 }
 0x213   :  { %1970 = vmatprep.subr.bf16.mxu1 %v2793_v55 }
 0x216   :  { %1972 = vmatpush3.bf16.msra.mxu1 %v1971_v22 }
 0x217   :  { %1973 = vmatprep.subr.bf16.mxu1 %v2793_v55 }
 0x21a   :  { %1975 = vmatpush3.bf16.msra.mxu1 %v1974_v3 }
 0x21b   :  { %1976 = vmatprep.subr.bf16.mxu1 %v2793_v55 }
 0x21e   :  { %1978 = vmatpush3.bf16.msra.mxu1 %v1977_v4 }
 0x21f   :  { %1979 = vmatprep.subr.bf16.mxu1 %v2793_v55 }
 0x221   :  { %1728 = vmatmul.mubr.f32.vlgmr.msra.gmra.mrb[0].mxu1 %v770_v8 }
 0x222   :  { %1981 = vmatpush3.bf16.msra.mxu1 %v2368_v44  ;;  %1762 = vmatprep.mubr.msk.f32.mxu1 %vm2205_vm0, %v2206_v36 }
 0x223   :  { %1982 = vmatprep.subr.bf16.mxu1 %v2793_v55 }
 0x226   :  { %1984 = vmatpush3.bf16.msra.mxu1 %v2417_v52 }
 0x227   :  { %1985 = vmatprep.subr.bf16.mxu1 %v2793_v55 }
 0x22a   :  { %1987 = vmatpush3.bf16.msra.mxu1 %v2431_v20 }
 0x22b   :  { %1988 = vmatprep.subr.bf16.mxu1 %v2793_v55 }
 0x22e   :  { %1990 = vmatpush3.bf16.msra.mxu1 %v2442_v62 }
 0x22f   :  { %1991 = vmatprep.subr.bf16.mxu1 %v2793_v55 }
 0x232   :  { %1993 = vmatpush3.bf16.msra.mxu1 %v2459_v53 }
 0x233   :  { %1994 = vmatprep.subr.bf16.mxu1 %v2793_v55 }
 0x236   :  { %1996 = vmatpush3.bf16.msra.mxu1 %v2607_v21 }
 0x237   :  { %1997 = vmatprep.subr.bf16.mxu1 %v2793_v55 }
 0x23a   :  { %1999 = vmatpush3.bf16.msra.mxu1 %v2615_v30 }
 0x23b   :  { %2000 = vmatprep.subr.bf16.mxu1 %v2793_v55 }
 0x23e   :  { %2002 = vmatpush3.bf16.msra.mxu1 %v2623_v38 }
 0x23f   :  { %2003 = vmatprep.subr.bf16.mxu1 %v2793_v55 }
 0x241   :  { %1763 = vmatmul.mubr.f32.vlgmr.msra.gmra.mrb[0].mxu1 %v771_v9 }
 0x242   :  { %2005 = vmatpush3.bf16.msra.mxu1 %v2004_v33  ;;  %1797 = vmatprep.mubr.msk.f32.mxu1 %vm2205_vm0, %v2206_v36 }
 0x243   :  { %2006 = vmatprep.subr.bf16.mxu1 %v2793_v55 }
 0x246   :  { %2008 = vmatpush3.bf16.msra.mxu1 %v2007_v28 }
 0x247   :  { %2009 = vmatprep.subr.bf16.mxu1 %v2793_v55 }
 0x24a   :  { %2011 = vmatpush3.bf16.msra.mxu1 %v2010_v50 }
 0x24b   :  { %2012 = vmatprep.subr.bf16.mxu1 %v2793_v55 }
 0x24e   :  { %2014 = vmatpush3.bf16.msra.mxu1 %v2013_v45 }
 0x24f   :  { %2015 = vmatprep.subr.bf16.mxu1 %v2793_v55 }
 0x252   :  { %2017 = vmatpush3.bf16.msra.mxu1 %v2016_v27 }
 0x253   :  { %2018 = vmatprep.subr.bf16.mxu1 %v2793_v55 }
 0x256   :  { %2020 = vmatpush3.bf16.msra.mxu1 %v2019_v56 }
 0x257   :  { %2021 = vmatprep.subr.bf16.mxu1 %v2793_v55 }
 0x25a   :  { %2023 = vmatpush3.bf16.msra.mxu1 %v2022_v49 }
 0x25b   :  { %2024 = vmatprep.subr.bf16.mxu1 %v2793_v55 }
 0x25e   :  { %2026 = vmatpush3.bf16.msra.mxu1 %v2025_v54 }
 0x25f   :  { %2027 = vmatprep.subr.bf16.mxu1 %v2793_v55 }
 0x261   :  { %1798 = vmatmul.mubr.f32.vlgmr.msra.gmra.mrb[0].mxu1 %v2628_v2 }
 0x262   :  { %2029 = vmatpush3.bf16.msra.mxu1 %v2368_v44  ;;  %1832 = vmatprep.mubr.msk.f32.mxu1 %vm2205_vm0, %v2206_v36 }
 0x263   :  { %2030 = vmatprep.subr.bf16.mxu1 %v2793_v55 }
 0x266   :  { %2032 = vmatpush3.bf16.msra.mxu1 %v2417_v52  ;;  %v1354_v52 = vld [vmem:[%s2753_s3] ss:$0 sm:$0xff] }
 0x267   :  { %2033 = vmatprep.subr.bf16.mxu1 %v2793_v55 }
 0x26a   :  { %2035 = vmatpush3.bf16.msra.mxu1 %v2431_v20 }
 0x26b   :  { %2036 = vmatprep.subr.bf16.mxu1 %v2793_v55 }
 0x26e   :  { %2038 = vmatpush3.bf16.msra.mxu1 %v2442_v62 }
 0x26f   :  { %2039 = vmatprep.subr.bf16.mxu1 %v2793_v55 }
 0x272   :  { %2041 = vmatpush3.bf16.msra.mxu1 %v2459_v53 }
 0x273   :  { %2042 = vmatprep.subr.bf16.mxu1 %v2793_v55 }
 0x276   :  { %2044 = vmatpush3.bf16.msra.mxu1 %v2607_v21 }
 0x277   :  { %2045 = vmatprep.subr.bf16.mxu1 %v2793_v55 }
 0x27a   :  { %2047 = vmatpush3.bf16.msra.mxu1 %v2615_v30 }
 0x27b   :  { %2048 = vmatprep.subr.bf16.mxu1 %v2793_v55 }
 0x27e   :  { %2050 = vmatpush3.bf16.msra.mxu1 %v2623_v38 }
 0x281   :  { %1833 = vmatmul.mubr.f32.vlgmr.msra.gmra.mrb[0].mxu1 %v2628_v2 }
 0x2dc   :  { %v775_v36 = vpop.f32.mrb[2].mxu0 }
 0x2dd   :  { %v1659_v44 = vpop.f32.mrb[3].mxu0  ;;  %v776_v20 = vadd.f32 %v1354_v52, %v775_v36 }
 0x354   :  { %v1325_v62 = vpop.f32.mrb[0].mxu1 }
 0x355   :  { %v2052_v53 = vadd.f32 %v1325_v62, %v776_v20  ;;  %v1834_v60 = vpop.f32.mrb[1].mxu1 }
 0x357   :  { %1329 = vst [vmem:[#allocation8] sm:$0xff] %v2052_v53 }
 0x358   :  { %2174 = shalt.err (!%p2171_p0)
}
 0x359   :  { %s2175_s5 = scalar_lea.hbm %s2754_s4, 128 }
 0x35a   :  { %p2176_p1 = scmp.ne.s32.totalorder %s2754_s4, %s2175_s5  ;;  %p2179_p2 = scmp.lt.u32.totalorder %s2175_s5, %s2754_s4 }
 0x35c   :  { %p2181_p3 = pnand %p2179_p2, %p2176_p1 }
 0x35e   :  { %2184 = shalt.err (!%p2181_p3)
}
 0x35f   :  { %1339 = dma.vmem_to_hbm [thread:$0]  %s1337_s27, 128, %s2754_s4, [#allocation4]  }
 0x360   :  { %2189 = dma.done.wait [#allocation4], 128  }
 0x361   :  { %2190 = vsyncadd [#allocation4], 4294967168 }
 0x362   :  { %1343 = vsyncpa [#allocation3], 1 }
 0x363   :  { %1344 = vsyncpa [#allocation6], 1 }
 0x364   :  { %1345 = vsyncpa [#allocation4], 1 }

</bundles_post_ra>
